<compile_context>
chip_gen: v7x
topology: tpu7x:2x2x1
jax: 0.10.0
libtpu: 0.0.40
codegen_flags: <defaults>
</compile_context>

<pallas_src>
import functools

import jax
import jax.numpy as jnp
from jax.experimental import pallas as pl
from jax.experimental.pallas import tpu as pltpu

PAD_TOKEN_ID = 1
IGNORE_INDEX = -100
DENOM_CORRECTION = 0.0   # args.denominator_correction_factor


def _round_up(x, m):
    return (x + m - 1) // m * m


# ----------------------------------------------------------------------------
# Fused kernel: tied LM head + shifted token cross-entropy.
#   hidden (tr, H) @ embed (tv, H)^T  ->  logits tile (tr, tv) kept in VMEM,
#   online logsumexp + gold-logit accumulation over vocab tiles,
#   per-token CE (ignore_index = -100) written once at the last vocab tile.
# ----------------------------------------------------------------------------
def fused_lmhead_ce_kernel(h_ref, w_ref, lbl_ref, ce_ref,
                           m_sc, l_sc, g_sc, *, tv, v_pad):
    j = pl.program_id(1)

    @pl.when(j == 0)
    def _():
        m_sc[...] = jnp.full(m_sc.shape, -jnp.inf, dtype=jnp.float32)
        l_sc[...] = jnp.zeros(l_sc.shape, dtype=jnp.float32)
        g_sc[...] = jnp.zeros(g_sc.shape, dtype=jnp.float32)

    # (tr, H) x (tv, H) contracting on H (i.e. hidden @ weight.T) on the MXU.
    # Weight stays in its native (V, H) layout — no transpose in HBM.
    s = jax.lax.dot_general(h_ref[...], w_ref[...],
                            dimension_numbers=(((1,), (1,)), ((), ())),
                            preferred_element_type=jnp.float32)      # (tr, tv)

    col = jax.lax.broadcasted_iota(jnp.int32, s.shape, 1)            # local 0..tv-1

    # Gold-logit gather via LOCAL iota vs (labels - j*tv); -100 never matches
    # (it goes negative), so ignored rows accumulate 0.
    rel = lbl_ref[...] - j * tv                                       # (tr, 1)
    g_sc[...] += jnp.sum(jnp.where(col == rel, s, 0.0),
                         axis=-1, keepdims=True)

    if v_pad:
        # Static branch: only taken when V was padded up to a multiple of tv.
        # Only the last vocab tile can contain padded columns.
        thresh = jnp.where(j == pl.num_programs(1) - 1, tv - v_pad, tv)
        s = jnp.where(col >= thresh, jnp.float32(-1e30), s)

    # online (numerically stable) logsumexp across vocab tiles
    m_prev = m_sc[...]
    m_new = jnp.maximum(m_prev, jnp.max(s, axis=-1, keepdims=True))
    l_sc[...] = (l_sc[...] * jnp.exp(m_prev - m_new)
                 + jnp.sum(jnp.exp(s - m_new), axis=-1, keepdims=True))
    m_sc[...] = m_new

    @pl.when(j == pl.num_programs(1) - 1)
    def _():
        lse = m_sc[...] + jnp.log(l_sc[...])
        valid = lbl_ref[...] != IGNORE_INDEX
        ce_ref[...] = jnp.where(valid, lse - g_sc[...], 0.0)


def fused_lmhead_ce(hidden, labels, weight, *, tr=None, tv=None):
    """Per-token CE of softmax(hidden @ weight.T) vs labels (ignore -100).

    hidden: (R, H) bf16/f32, labels: (R,) int32, weight: (V, H) bf16/f32.
    Returns (R,) f32 per-token losses (0.0 where label == -100).
    """
    R, H = hidden.shape
    V, H2 = weight.shape
    assert H == H2

    # MXU-friendly contraction dim: zero-pad H to a multiple of 128
    # (dot product unchanged by zero padding).
    Hp = _round_up(H, 128)
    if Hp != H:
        hidden = jnp.pad(hidden, ((0, 0), (0, Hp - H)))
        weight = jnp.pad(weight, ((0, 0), (0, Hp - H)))
        H = Hp

    # Row tile: arithmetic intensity on the streamed weight is exactly `tr`
    # FLOPs per weight byte -> tr >= 512 keeps v6e MXU-bound.  Keep >= 2 row
    # tiles so v7x megacore can shard the "parallel" row axis over both TCs.
    if tr is None:
        tr = min(512, _round_up(R, 8))
        if R > 8 and pl.cdiv(R, tr) < 2:
            tr = max(8, _round_up(pl.cdiv(R, 2), 8))
    Rp = _round_up(R, tr)
    if Rp != R:
        hidden = jnp.pad(hidden, ((0, Rp - R), (0, 0)))
        labels = jnp.pad(labels, (0, Rp - R), constant_values=IGNORE_INDEX)

    # Vocab tile: large tiles -> few "arbitrary" grid steps (less per-step
    # pipeline overhead) and large weight DMAs.  V is padded to a multiple of
    # tv; padded columns are masked inside the kernel.
    if tv is None:
        tv = _round_up(V, 128) if V <= 2048 else 2048
    Vp = _round_up(V, tv)
    v_pad = Vp - V
    assert v_pad < tv
    if Vp != V:
        weight = jnp.pad(weight, ((0, Vp - V), (0, 0)))

    labels2d = labels.reshape(Rp, 1).astype(jnp.int32)

    wbytes = weight.dtype.itemsize
    hbytes = hidden.dtype.itemsize
    # Explicit VMEM budget: weight double-buffer + hidden double-buffer +
    # in-flight f32 logits tile + small scratch.  Cap at 64 MiB (v7x physical).
    vmem_est = (2 * tv * H * wbytes + 2 * tr * H * hbytes
                + tr * tv * 4 + 8 * tr * 4)
    vmem_limit = int(min(max(2 * vmem_est, 32 << 20), 64 << 20))

    cost = pl.CostEstimate(
        flops=2 * Rp * H * Vp,
        transcendentals=Rp * Vp,
        bytes_accessed=(Rp // tr) * Vp * H * wbytes + Rp * H * hbytes + 2 * Rp * 4,
    )

    ce = pl.pallas_call(
        functools.partial(fused_lmhead_ce_kernel, tv=tv, v_pad=v_pad),
        out_shape=jax.ShapeDtypeStruct((Rp, 1), jnp.float32),
        grid=(Rp // tr, Vp // tv),
        in_specs=[pl.BlockSpec((tr, H), lambda i, j: (i, 0)),   # resident over j
                  pl.BlockSpec((tv, H), lambda i, j: (j, 0)),   # streamed weight
                  pl.BlockSpec((tr, 1), lambda i, j: (i, 0))],
        out_specs=pl.BlockSpec((tr, 1), lambda i, j: (i, 0)),
        scratch_shapes=[pltpu.VMEM((tr, 1), jnp.float32),   # running max
                        pltpu.VMEM((tr, 1), jnp.float32),   # running sum-exp
                        pltpu.VMEM((tr, 1), jnp.float32)],  # gold-logit acc
        compiler_params=pltpu.CompilerParams(
            dimension_semantics=("parallel", "arbitrary"),
            vmem_limit_bytes=vmem_limit),
        cost_estimate=cost,
    )(hidden, weight, labels2d)
    return ce[:R, 0]


# ----------------------------------------------------------------------------
# Surrogate BART (deterministic synthetic weights): encoder context pooling +
# decoder token embeddings for positions 0..Ld-2 only (the shift is applied
# here, so no full-length logits are ever produced).
# ----------------------------------------------------------------------------
def surrogate_hidden(embed, enc_ids, enc_mask, dec_ids_shifted):
    enc_emb = embed[enc_ids]                                    # (N, Le, H)
    mask = enc_mask[..., None].astype(embed.dtype)
    ctx = jnp.sum(enc_emb * mask, axis=1) / jnp.maximum(
        jnp.sum(mask, axis=1), 1.0)                             # (N, H)
    dec_emb = embed[dec_ids_shifted]                            # (N, Ld-1, H)
    return dec_emb + ctx[:, None, :]                            # (N, Ld-1, H)


# ----------------------------------------------------------------------------
# evaluate_stage of bart_mask_random (pro_type == 'sqrt')
# ----------------------------------------------------------------------------
def evaluate_stage(inputs, embed):
    enc_in, enc_mask, dec_in, dec_mask, labels, mask_indexes, targets = inputs
    B, C, Ld = dec_in.shape
    Le = enc_in.shape[-1]
    N = B * C
    L = Ld - 1

    enc_in = enc_in.reshape(N, Le)
    enc_mask = enc_mask.reshape(N, Le)
    dec_in = dec_in.reshape(N, Ld)
    labels = labels.reshape(N, Ld)
    labels = jnp.where(labels == PAD_TOKEN_ID, IGNORE_INDEX, labels)

    # Shift applied up-front: hidden only for positions 0..Ld-2,
    # labels only for positions 1..Ld-1.
    hidden = surrogate_hidden(embed, enc_in, enc_mask, dec_in[:, :L])  # (N, L, H)
    shift_labels = labels[:, 1:]                                       # (N, L)

    # bf16 MXU operands, f32 accumulation / CE math inside the kernel.
    ce = fused_lmhead_ce(
        hidden.reshape(N * L, -1).astype(jnp.bfloat16),
        shift_labels.reshape(N * L),
        embed.astype(jnp.bfloat16),
    ).reshape(N, L)                                                    # (N, L)

    # pro_type == 'sqrt': score = -(sum(ce) / count_nonzero(ce) + corr).
    # Negligible work -> plain jnp (no extra kernel launch).  Mirrors the
    # torch reference exactly, including count_nonzero applied to the CE
    # values themselves (div-by-zero -> inf if a choice has no nonzero CE).
    nonzero = jnp.sum((ce != 0.0).astype(jnp.float32), axis=-1)        # (N,)
    scores = -(jnp.sum(ce, axis=-1) / nonzero + DENOM_CORRECTION)      # (N,)
    scores = scores.reshape(B, C)
    # TODO(synk): 'mul' and plain-sum pro_type branches not exercised here.
    return None, scores, targets


def forward(pre_order_inputs, embed):
    # args.stage_mode == 'evaluate_model' (module is not in training mode)
    _, pre_order_logits, pre_order_targets = evaluate_stage(pre_order_inputs, embed)
    return None, pre_order_logits, pre_order_targets


# ----------------------------------------------------------------------------
# Pure-jnp reference (same bf16-cast matmul operands) for validation.
# ----------------------------------------------------------------------------
def _reference_scores(inputs, embed):
    enc_in, enc_mask, dec_in, dec_mask, labels, mask_indexes, targets = inputs
    B, C, Ld = dec_in.shape
    Le = enc_in.shape[-1]
    N, L = B * C, Ld - 1
    enc_in = enc_in.reshape(N, Le)
    enc_mask = enc_mask.reshape(N, Le)
    dec_in = dec_in.reshape(N, Ld)
    labels = labels.reshape(N, Ld)
    labels = jnp.where(labels == PAD_TOKEN_ID, IGNORE_INDEX, labels)
    hidden = surrogate_hidden(embed, enc_in, enc_mask, dec_in[:, :L])
    shift_labels = labels[:, 1:].reshape(-1)
    h = hidden.reshape(N * L, -1).astype(jnp.bfloat16).astype(jnp.float32)
    w = embed.astype(jnp.bfloat16).astype(jnp.float32)
    logits = h @ w.T
    lse = jax.nn.logsumexp(logits, axis=-1)
    gold = jnp.take_along_axis(
        logits, jnp.clip(shift_labels, 0, w.shape[0] - 1)[:, None], axis=1)[:, 0]
    ce = jnp.where(shift_labels != IGNORE_INDEX, lse - gold, 0.0).reshape(N, L)
    nonzero = jnp.sum((ce != 0.0).astype(jnp.float32), axis=-1)
    return (-(jnp.sum(ce, axis=-1) / nonzero + DENOM_CORRECTION)).reshape(B, C)


# ----------------------------------------------------------------------------
if __name__ == "__main__":
    B, C = 2, 2            # batch, num_choices
    Le, Ld = 8, 8          # encode_len, decode_len
    H, V = 128, 1000       # hidden (MXU-friendly), vocab (not a tile multiple
                           # -> exercises the in-kernel padded-column masking)

    key = jax.random.PRNGKey(0)
    k_emb, k_enc, k_dec, k_lab, k_tgt = jax.random.split(key, 5)

    embed = jax.random.normal(k_emb, (V, H), dtype=jnp.float32) * 0.02

    enc_in = jax.random.randint(k_enc, (B, C, Le), 2, V, dtype=jnp.int32)
    enc_mask = jnp.ones((B, C, Le), dtype=jnp.int32).at[:, :, -2:].set(0)
    dec_in = jax.random.randint(k_dec, (B, C, Ld), 2, V, dtype=jnp.int32)
    dec_mask = jnp.ones((B, C, Ld), dtype=jnp.int32)
    labels = jax.random.randint(k_lab, (B, C, Ld), 2, V, dtype=jnp.int32)
    labels = labels.at[:, :, -2:].set(PAD_TOKEN_ID)    # trailing pads -> ignored
    mask_indexes = jnp.zeros((B, C), dtype=jnp.int32)
    targets = jax.random.randint(k_tgt, (B,), 0, C, dtype=jnp.int32)

    inputs = (enc_in, enc_mask, dec_in, dec_mask, labels, mask_indexes, targets)

    loss, logits, tgts = jax.jit(forward)(inputs, embed)
    jax.block_until_ready(logits)
    jax.block_until_ready(tgts)

    ref = _reference_scores(inputs, embed)
    assert logits.shape == (B, C) and logits.dtype == jnp.float32
    assert bool(jnp.all(jnp.isfinite(logits)))
    assert bool(jnp.allclose(logits, ref, rtol=2e-2, atol=2e-2)), (logits, ref)
    print("KERNEL_OK")
</pallas_src>

<mosaic_0001>
module attributes {stable_mosaic.version = 11 : i64} {
  func.func @fused_lmhead_ce_kernel(%arg0: i32, %arg1: i32, %arg2: memref<16x128xbf16, #tpu.memory_space<vmem>>, %arg3: memref<1024x128xbf16, #tpu.memory_space<vmem>>, %arg4: memref<16x1xi32, #tpu.memory_space<vmem>>, %arg5: memref<16x1xf32, #tpu.memory_space<vmem>>, %arg6: memref<16x1xf32, #tpu.memory_space<vmem>>, %arg7: memref<16x1xf32, #tpu.memory_space<vmem>>, %arg8: memref<16x1xf32, #tpu.memory_space<vmem>>) attributes {dimension_semantics = [#tpu.dimension_semantics<parallel>, #tpu.dimension_semantics<arbitrary>], iteration_bounds = array<i64: 2, 1>, scalar_prefetch = 0 : i64, scratch_operands = 3 : i64, tpu.core_type = #tpu.core_type<tc>, window_params = [{transform_indices = @transform_0, window_bounds = array<i64: 16, 128>}, {transform_indices = @transform_1, window_bounds = array<i64: 1024, 128>}, {transform_indices = @transform_2, window_bounds = array<i64: 16, 1>}, {transform_indices = @transform_3, window_bounds = array<i64: 16, 1>}]} {
    %c0_i32 = arith.constant 0 : i32
    %0 = arith.cmpi eq, %arg1, %c0_i32 : i32
    %1 = arith.extui %0 : i1 to i32
    %c0_i32_0 = arith.constant 0 : i32
    %2 = arith.cmpi ne, %1, %c0_i32_0 : i32
    scf.if %2 {
      %cst_27 = arith.constant 0xFF800000 : f32
      %45 = vector.broadcast %cst_27 : f32 to vector<16x1xf32>
      %c0_28 = arith.constant 0 : index
      %c0_29 = arith.constant 0 : index
      %46 = vector.load %arg6[%c0_28, %c0_29] : memref<16x1xf32, #tpu.memory_space<vmem>>, vector<16x1xf32>
      tpu.vector_store %arg6[%c0_28, %c0_29], %45 {strides = array<i32>} : memref<16x1xf32, #tpu.memory_space<vmem>>, vector<16x1xf32>,
      %cst_30 = arith.constant 0.000000e+00 : f32
      %47 = vector.broadcast %cst_30 : f32 to vector<16x1xf32>
      %c0_31 = arith.constant 0 : index
      %c0_32 = arith.constant 0 : index
      %48 = vector.load %arg7[%c0_31, %c0_32] : memref<16x1xf32, #tpu.memory_space<vmem>>, vector<16x1xf32>
      tpu.vector_store %arg7[%c0_31, %c0_32], %47 {strides = array<i32>} : memref<16x1xf32, #tpu.memory_space<vmem>>, vector<16x1xf32>,
      %cst_33 = arith.constant 0.000000e+00 : f32
      %49 = vector.broadcast %cst_33 : f32 to vector<16x1xf32>
      %c0_34 = arith.constant 0 : index
      %c0_35 = arith.constant 0 : index
      %50 = vector.load %arg8[%c0_34, %c0_35] : memref<16x1xf32, #tpu.memory_space<vmem>>, vector<16x1xf32>
      tpu.vector_store %arg8[%c0_34, %c0_35], %49 {strides = array<i32>} : memref<16x1xf32, #tpu.memory_space<vmem>>, vector<16x1xf32>,
    } else {
    }
    %c0 = arith.constant 0 : index
    %c0_1 = arith.constant 0 : index
    %3 = vector.load %arg2[%c0, %c0_1] : memref<16x128xbf16, #tpu.memory_space<vmem>>, vector<16x128xbf16>
    %c0_2 = arith.constant 0 : index
    %c0_3 = arith.constant 0 : index
    %4 = vector.load %arg3[%c0_2, %c0_3] : memref<1024x128xbf16, #tpu.memory_space<vmem>>, vector<1024x128xbf16>
    %cst = arith.constant dense<0.000000e+00> : vector<16x1024xf32>
    %5 = tpu.matmul %3, %4, %cst {dimension_numbers = #tpu.dot_dimension_numbers<[1], [1], [0], [0], [0, 0, 1, 0], [], []>} : vector<16x128xbf16>, vector<1024x128xbf16>, vector<16x1024xf32> -> vector<16x1024xf32>
    %6 = tpu.iota {dimensions = array<i32: 1>} : vector<16x1024xi32>
    %c0_4 = arith.constant 0 : index
    %c0_5 = arith.constant 0 : index
    %7 = vector.load %arg4[%c0_4, %c0_5] : memref<16x1xi32, #tpu.memory_space<vmem>>, vector<16x1xi32>
    %c1024_i32 = arith.constant 1024 : i32
    %8 = arith.muli %arg1, %c1024_i32 : i32
    %9 = vector.broadcast %8 : i32 to vector<16x1xi32>
    %10 = arith.subi %7, %9 : vector<16x1xi32>
    %c0_6 = arith.constant 0 : index
    %c0_7 = arith.constant 0 : index
    %11 = vector.load %arg8[%c0_6, %c0_7] : memref<16x1xf32, #tpu.memory_space<vmem>>, vector<16x1xf32>
    %12 = vector.broadcast %10 : vector<16x1xi32> to vector<16x1024xi32>
    %13 = arith.cmpi eq, %6, %12 : vector<16x1024xi32>
    %cst_8 = arith.constant 0.000000e+00 : f32
    %14 = vector.broadcast %cst_8 : f32 to vector<16x1024xf32>
    %15 = arith.select %13, %5, %14 : vector<16x1024xi1>, vector<16x1024xf32>
    %cst_9 = arith.constant dense<0.000000e+00> : vector<16xf32>
    %16 = vector.multi_reduction <add>, %15, %cst_9 [1] : vector<16x1024xf32> to vector<16xf32>
    %17 = vector.shape_cast %16 : vector<16xf32> to vector<16x1xf32>
    %18 = arith.addf %11, %17 : vector<16x1xf32>
    %c0_10 = arith.constant 0 : index
    %c0_11 = arith.constant 0 : index
    %19 = vector.load %arg8[%c0_10, %c0_11] : memref<16x1xf32, #tpu.memory_space<vmem>>, vector<16x1xf32>
    tpu.vector_store %arg8[%c0_10, %c0_11], %18 {strides = array<i32>} : memref<16x1xf32, #tpu.memory_space<vmem>>, vector<16x1xf32>,
    %c0_i32_12 = arith.constant 0 : i32
    %20 = arith.cmpi eq, %arg1, %c0_i32_12 : i32
    %c1000_i32 = arith.constant 1000 : i32
    %c1024_i32_13 = arith.constant 1024 : i32
    %21 = arith.select %20, %c1000_i32, %c1024_i32_13 : i32
    %22 = vector.broadcast %21 : i32 to vector<16x1024xi32>
    %23 = arith.cmpi sge, %6, %22 : vector<16x1024xi32>
    %cst_14 = arith.constant -1.000000e+30 : f32
    %24 = vector.broadcast %cst_14 : f32 to vector<16x1024xf32>
    %25 = arith.select %23, %24, %5 : vector<16x1024xi1>, vector<16x1024xf32>
    %c0_15 = arith.constant 0 : index
    %c0_16 = arith.constant 0 : index
    %26 = vector.load %arg6[%c0_15, %c0_16] : memref<16x1xf32, #tpu.memory_space<vmem>>, vector<16x1xf32>
    %cst_17 = arith.constant dense<0xFF800000> : vector<16xf32>
    %27 = vector.multi_reduction <maximumf>, %25, %cst_17 [1] : vector<16x1024xf32> to vector<16xf32>
    %28 = vector.shape_cast %27 : vector<16xf32> to vector<16x1xf32>
    %29 = arith.maximumf %26, %28 : vector<16x1xf32>
    %c0_18 = arith.constant 0 : index
    %c0_19 = arith.constant 0 : index
    %30 = vector.load %arg7[%c0_18, %c0_19] : memref<16x1xf32, #tpu.memory_space<vmem>>, vector<16x1xf32>
    %31 = arith.subf %26, %29 : vector<16x1xf32>
    %32 = math.exp %31 : vector<16x1xf32>
    %33 = arith.mulf %30, %32 : vector<16x1xf32>
    %34 = vector.broadcast %29 : vector<16x1xf32> to vector<16x1024xf32>
    %35 = arith.subf %25, %34 : vector<16x1024xf32>
    %36 = math.exp %35 : vector<16x1024xf32>
    %cst_20 = arith.constant dense<0.000000e+00> : vector<16xf32>
    %37 = vector.multi_reduction <add>, %36, %cst_20 [1] : vector<16x1024xf32> to vector<16xf32>
    %38 = vector.shape_cast %37 : vector<16xf32> to vector<16x1xf32>
    %39 = arith.addf %33, %38 : vector<16x1xf32>
    %c0_21 = arith.constant 0 : index
    %c0_22 = arith.constant 0 : index
    %40 = vector.load %arg7[%c0_21, %c0_22] : memref<16x1xf32, #tpu.memory_space<vmem>>, vector<16x1xf32>
    tpu.vector_store %arg7[%c0_21, %c0_22], %39 {strides = array<i32>} : memref<16x1xf32, #tpu.memory_space<vmem>>, vector<16x1xf32>,
    %c0_23 = arith.constant 0 : index
    %c0_24 = arith.constant 0 : index
    %41 = vector.load %arg6[%c0_23, %c0_24] : memref<16x1xf32, #tpu.memory_space<vmem>>, vector<16x1xf32>
    tpu.vector_store %arg6[%c0_23, %c0_24], %29 {strides = array<i32>} : memref<16x1xf32, #tpu.memory_space<vmem>>, vector<16x1xf32>,
    %c0_i32_25 = arith.constant 0 : i32
    %42 = arith.cmpi eq, %arg1, %c0_i32_25 : i32
    %43 = arith.extui %42 : i1 to i32
    %c0_i32_26 = arith.constant 0 : i32
    %44 = arith.cmpi ne, %43, %c0_i32_26 : i32
    scf.if %44 {
      %c0_27 = arith.constant 0 : index
      %c0_28 = arith.constant 0 : index
      %45 = vector.load %arg6[%c0_27, %c0_28] : memref<16x1xf32, #tpu.memory_space<vmem>>, vector<16x1xf32>
      %c0_29 = arith.constant 0 : index
      %c0_30 = arith.constant 0 : index
      %46 = vector.load %arg7[%c0_29, %c0_30] : memref<16x1xf32, #tpu.memory_space<vmem>>, vector<16x1xf32>
      %47 = math.log %46 : vector<16x1xf32>
      %48 = arith.addf %45, %47 : vector<16x1xf32>
      %c0_31 = arith.constant 0 : index
      %c0_32 = arith.constant 0 : index
      %49 = vector.load %arg4[%c0_31, %c0_32] : memref<16x1xi32, #tpu.memory_space<vmem>>, vector<16x1xi32>
      %c-100_i32 = arith.constant -100 : i32
      %50 = vector.broadcast %c-100_i32 : i32 to vector<16x1xi32>
      %51 = arith.cmpi ne, %49, %50 : vector<16x1xi32>
      %c0_33 = arith.constant 0 : index
      %c0_34 = arith.constant 0 : index
      %52 = vector.load %arg8[%c0_33, %c0_34] : memref<16x1xf32, #tpu.memory_space<vmem>>, vector<16x1xf32>
      %53 = arith.subf %48, %52 : vector<16x1xf32>
      %cst_35 = arith.constant 0.000000e+00 : f32
      %54 = vector.broadcast %cst_35 : f32 to vector<16x1xf32>
      %55 = arith.select %51, %53, %54 : vector<16x1xi1>, vector<16x1xf32>
      %c0_36 = arith.constant 0 : index
      %c0_37 = arith.constant 0 : index
      %56 = vector.load %arg5[%c0_36, %c0_37] : memref<16x1xf32, #tpu.memory_space<vmem>>, vector<16x1xf32>
      tpu.vector_store %arg5[%c0_36, %c0_37], %55 {strides = array<i32>} : memref<16x1xf32, #tpu.memory_space<vmem>>, vector<16x1xf32>,
    } else {
    }
    return
  }
  func.func @transform_0(%arg0: i32, %arg1: i32) -> (i32, i32) {
    %c0_i32 = arith.constant 0 : i32
    %c0_i32_0 = arith.constant 0 : i32
    return %arg0, %c0_i32 : i32, i32
  }
  func.func @transform_1(%arg0: i32, %arg1: i32) -> (i32, i32) {
    %c0_i32 = arith.constant 0 : i32
    %c0_i32_0 = arith.constant 0 : i32
    return %arg1, %c0_i32 : i32, i32
  }
  func.func @transform_2(%arg0: i32, %arg1: i32) -> (i32, i32) {
    %c0_i32 = arith.constant 0 : i32
    %c0_i32_0 = arith.constant 0 : i32
    return %arg0, %c0_i32 : i32, i32
  }
  func.func @transform_3(%arg0: i32, %arg1: i32) -> (i32, i32) {
    %c0_i32 = arith.constant 0 : i32
    %c0_i32_0 = arith.constant 0 : i32
    return %arg0, %c0_i32 : i32, i32
  }
}

</mosaic_0001>

<bundles_post_ra>
// kernel: squeeze.1
= control target key start
LH: loop header
LB: loop body
LE: loop exit
PB: predicated region body
PF: predicated region fallthrough
CT: control target
= control target key end

     0   :  { %s37_s8 = smov 107   ;;  %vm7_vm0 = vcmask 56320   ;;  %s38_s9 = smov 114   ;;  %s55_s0 = inlined_call_operand.vmem [shape: f32[28], index: 0, kind: input, shape index: {}]   ;;  %s56_s1 = inlined_call_operand.vmem [shape: f32[4,7], index: 1, kind: output, shape index: {}]  }
   0x1   :  { %v4_v0 = vld [vmem:[%s55_s0] sm:$0x1]  ;;  %s36_s0 = smov 121  }
   0x2   :  { %5 = vst [vmem:[#allocation1] sm:$0x1] %v4_v0 }
   0x9   :  { %v9_v1 = vld [vmem:[#allocation1] sm:$0x1]  }
   0xa   :  { %v21_v2 = vld [vmem:[#allocation1] sm:$0x1]   ;;  %10 = vrot.lane.b32.xlu0 %v9_v1, %s36_s0 }
   0xb   :  { %22 = vrot.lane.b32.xlu1 %v21_v2, %s37_s8  ;;  %v6_v3 = vld [vmem:[#allocation1] sm:$0x1]  }
   0xc   :  { %v15_v4 = vld [vmem:[#allocation1] sm:$0x1]   ;;  %8 = vst.msk [vmem:[#allocation0] sm:$0x1] %vm7_vm0, %v6_v3  }
   0xe   :  { %16 = vrot.lane.b32.xlu0 %v15_v4, %s38_s9 }
  0x7c   :  { %v11_v5 = vpop.permute.xlu0 %10  }
  0x7d   :  { %v23_v6 = vpop.permute.xlu1 %22   ;;  %14 = vst.msk [vmem:[#allocation0 + $0x1] sm:$0x1] %vm7_vm0, %v11_v5  }
  0x7e   :  { %26 = vst.msk [vmem:[#allocation0 + $0x3] sm:$0x1] %vm7_vm0, %v23_v6  }
  0x80   :  { %v17_v7 = vpop.permute.xlu0 %16  }
  0x81   :  { %20 = vst.msk [vmem:[#allocation0 + $0x2] sm:$0x1] %vm7_vm0, %v17_v7  }
  0x88   :  { %v30_v8 = vld [vmem:[#allocation0] sm:$0xf] }
  0x89   :  { %32 = vst [vmem:[%s56_s1] sm:$0xf] %v30_v8 }

// kernel: forward.1
= control target key start
LH: loop header
LB: loop body
LE: loop exit
PB: predicated region body
PF: predicated region fallthrough
CT: control target
= control target key end

     0   :  { %s1601_s12 = smov 0   ;;  %s1603_s13 = smov 0   ;;  %s2032_s0 = inlined_call_operand.vmem [shape: bf16[32,128], index: 0, kind: input, shape index: {}]   ;;  %s2033_s1 = inlined_call_operand.vmem [shape: bf16[1024,128], index: 1, kind: input, shape index: {}]   ;;  %s2034_s2 = inlined_call_operand.vmem [shape: s32[32,1], index: 2, kind: input, shape index: {}]   ;;  %s2035_s3 = inlined_call_operand.vmem [shape: f32[32,1], index: 3, kind: output, shape index: {}]  }
   0x1   :  { %s1605_s14 = smov 0  }
   0x2 LB: > { %s25_s15 = sadd.s32 1, %s1572_s13  ;;  %p1274_p0 = scmp.ge.s32.totalorder %s1576_s14, 1  ;;  %s1576_s14 = sphi %s1605_s14, %s13_s14   ;;  %s1572_s13 = sphi %s1603_s13, %s2037_s13   ;;  %s1568_s12 = sphi %s1601_s12, %s2036_s12  }
   0x3   : > { %p27_p1 = scmp.ge.s32.totalorder %s25_s15, 2  ;;  %p172_p2 = scmp.lt.s32.totalorder %s1576_s14, 3 }
   0x5   : > { %s2039_s15 = smov (%p27_p1, %s25_s15), 0  ;;  %p173_p3 = pnand %p1274_p0, %p172_p2 }
   0x6   : > { %v1449_v0 = vld [vmem:[%s2033_s1 + $0x40] sm:$0xff] (!%p173_p3)   ;;  %v1453_v4 = vld [vmem:[%s2033_s1 + $0x48] sm:$0xff] (!%p173_p3)   ;;  %v1457_v8 = vld [vmem:[%s2033_s1 + $0x50] sm:$0xff] (!%p173_p3)   ;;  %s1275_s11 = sshll.u32 (!%p173_p3), %s1568_s12, 1  ;;  %vm235_vm0 = vcmask (!%p173_p3), 7168  }
   0x7   : > { %176 = sbr.rel (%p173_p3) target bundleno = 833 (0x341), region = 32  ;;  %v1450_v1 = vld [vmem:[%s2033_s1 + $0xc0] sm:$0xff] (!%p173_p3)   ;;  %1348 = vmatprep.subr.bf16.mxu0 (!%p173_p3), %v1449_v0  ;;  %v1454_v5 = vld [vmem:[%s2033_s1 + $0xc8] sm:$0xff] (!%p173_p3)   ;;  %v1458_v9 = vld [vmem:[%s2033_s1 + $0xd0] sm:$0xff] (!%p173_p3)   ;;  %p207_p4 = scmp.lt.s32.totalorder (!%p173_p3), %s1275_s11, 3 }
   0x8   : > { %v1451_v2 = vld [vmem:[%s2033_s1] sm:$0xff] (!%p173_p3)   ;;  %1366 = vmatprep.subr.bf16.mxu1 (!%p173_p3), %v1450_v1  ;;  %v1455_v6 = vld [vmem:[%s2033_s1 + $0x8] sm:$0xff] (!%p173_p3)   ;;  %v1459_v10 = vld [vmem:[%s2033_s1 + $0x10] sm:$0xff] (!%p173_p3)   ;;  %v1578_v1 = vmov (!%p173_p3), 0  }
   0x9   : > { %v1452_v3 = vld [vmem:[%s2033_s1 + $0x80] sm:$0xff] (!%p173_p3)   ;;  %1349 = vmatpush3.bf16.xpose.msra.mxu0 (!%p173_p3), %v1451_v2  ;;  %v1456_v7 = vld [vmem:[%s2033_s1 + $0x88] sm:$0xff] (!%p173_p3)   ;;  %v1460_v11 = vld [vmem:[%s2033_s1 + $0x90] sm:$0xff] (!%p173_p3)   ;;  %1448 = vset.pattern.permute.xlu0 (!%p173_p3), %v1578_v1  ;;  %v1579_v2 = vmov (!%p173_p3), -inf  }
   0xa   : > { %1367 = vmatpush3.bf16.xpose.msra.mxu1 (!%p173_p3), %v1452_v3  ;;  %1350 = vmatprep.subr.bf16.mxu0 (!%p173_p3), %v1453_v4  ;;  %v1461_v12 = vld [vmem:[%s2033_s1 + $0x58] sm:$0xff] (!%p173_p3)   ;;  %v1465_v16 = vld [vmem:[%s2033_s1 + $0x60] sm:$0xff] (!%p173_p3)   ;;  %v1469_v21 = vld [vmem:[%s2033_s1 + $0x68] sm:$0xff] (!%p173_p3)   ;;  %236 = vst.msk [vmem:[#allocation2] sm:$0xff] (!%p173_p3), %vm235_vm0, %v1579_v2 }
   0xb   : > { %1368 = vmatprep.subr.bf16.mxu1 (!%p173_p3), %v1454_v5  ;;  %v1462_v13 = vld [vmem:[%s2033_s1 + $0xd8] sm:$0xff] (!%p173_p3)   ;;  %v1466_v17 = vld [vmem:[%s2033_s1 + $0xe0] sm:$0xff] (!%p173_p3)   ;;  %v1470_v22 = vld [vmem:[%s2033_s1 + $0xe8] sm:$0xff] (!%p173_p3)   ;;  %1447 = vset.pattern.permute.xlu1 (!%p173_p3), %v1578_v1  ;;  %237 = vst.msk [vmem:[#allocation2 + $0x8] sm:$0xff] (!%p173_p3), %vm235_vm0, %v1579_v2 }
   0xc   : > { %v1463_v14 = vld [vmem:[%s2033_s1 + $0x18] sm:$0xff] (!%p173_p3)   ;;  %v1467_v18 = vld [vmem:[%s2033_s1 + $0x20] sm:$0xff] (!%p173_p3)   ;;  %v1471_v23 = vld [vmem:[%s2033_s1 + $0x28] sm:$0xff] (!%p173_p3)  }
   0xd   : > { %v1464_v15 = vld [vmem:[%s2033_s1 + $0x98] sm:$0xff] (!%p173_p3)   ;;  %v1468_v19 = vld [vmem:[%s2033_s1 + $0xa0] sm:$0xff] (!%p173_p3)   ;;  %v1472_v24 = vld [vmem:[%s2033_s1 + $0xa8] sm:$0xff] (!%p173_p3)  }
   0xe   : > { %s2041_s11 = smov (!%p207_p4, %s1275_s11), 3  ;;  %v1473_v25 = vld [vmem:[%s2033_s1 + $0x70] sm:$0xff]   ;;  %v1477_v29 = vld [vmem:[%s2033_s1 + $0x78] sm:$0xff]   ;;  %v1482_v33 = vld [vmem:[%s2033_s1 + $0x140] sm:$0xff]  }
   0xf   : > { %s1276_s29 = sshll.u32 %s2041_s11, 2  ;;  %v1474_v26 = vld [vmem:[%s2033_s1 + $0xf0] sm:$0xff]   ;;  %v1478_v30 = vld [vmem:[%s2033_s1 + $0xf8] sm:$0xff]   ;;  %v1483_v34 = vld [vmem:[%s2033_s1 + $0x1c0] sm:$0xff]   ;;  %s1278_s6 = sshll.u32 %s2041_s11, 3 }
  0x10   : > { %s210_s5 = scalar_lea.vmem %s2032_s0, %s1276_s29  ;;  %v1475_v27 = vld [vmem:[%s2033_s1 + $0x30] sm:$0xff]   ;;  %v1479_v31 = vld [vmem:[%s2033_s1 + $0x38] sm:$0xff]   ;;  %v1484_v35 = vld [vmem:[%s2033_s1 + $0x100] sm:$0xff]   ;;  %s222_s9 = scalar_lea.vmem %s2034_s2, %s1278_s6 }
  0x11   : > { %1351 = vmatpush3.bf16.xpose.msra.mxu0 %v1455_v6  ;;  %v1688_v20 = vld [vmem:[%s210_s5] sm:$0xff]   ;;  %v1476_v28 = vld [vmem:[%s2033_s1 + $0xb0] sm:$0xff]   ;;  %v1480_v32 = vld [vmem:[%s2033_s1 + $0xb8] sm:$0xff]   ;;  %s228_s17 = scalar_lea.vmem %s2035_s3, %s1278_s6 }
  0x12   : > { %1369 = vmatpush3.bf16.xpose.msra.mxu1 %v1456_v7  ;;  %1352 = vmatprep.subr.bf16.mxu0 %v1457_v8  ;;  %v1485_v36 = vld [vmem:[%s2033_s1 + $0x180] sm:$0xff]   ;;  %v1486_v37 = vld [vmem:[%s2033_s1 + $0x148] sm:$0xff]   ;;  %v1490_v41 = vld [vmem:[%s2033_s1 + $0x150] sm:$0xff]  }
  0x13   : > { %1370 = vmatprep.subr.bf16.mxu1 %v1458_v9  ;;  %1364 = vmatprep.mubr.bf16.mxu0 %v1688_v20  ;;  %v1487_v38 = vld [vmem:[%s2033_s1 + $0x1c8] sm:$0xff]   ;;  %v1491_v42 = vld [vmem:[%s2033_s1 + $0x1d0] sm:$0xff]   ;;  %v1494_v45 = vld [vmem:[%s2033_s1 + $0x158] sm:$0xff]  }
  0x14   : > { %1382 = vmatprep.mubr.bf16.mxu1 %v1688_v20  ;;  %v1488_v39 = vld [vmem:[%s2033_s1 + $0x108] sm:$0xff]   ;;  %v1492_v43 = vld [vmem:[%s2033_s1 + $0x110] sm:$0xff]   ;;  %v1495_v46 = vld [vmem:[%s2033_s1 + $0x1d8] sm:$0xff]  }
  0x15   : > { %v1489_v40 = vld [vmem:[%s2033_s1 + $0x188] sm:$0xff]   ;;  %v1493_v44 = vld [vmem:[%s2033_s1 + $0x190] sm:$0xff]   ;;  %v1496_v47 = vld [vmem:[%s2033_s1 + $0x118] sm:$0xff]  }
  0x16   : > { %v1497_v48 = vld [vmem:[%s2033_s1 + $0x198] sm:$0xff]   ;;  %v1498_v49 = vld [vmem:[%s2033_s1 + $0x160] sm:$0xff]   ;;  %v1502_v53 = vld [vmem:[%s2033_s1 + $0x168] sm:$0xff]  }
  0x17   : > { %v1499_v50 = vld [vmem:[%s2033_s1 + $0x1e0] sm:$0xff]   ;;  %v1503_v54 = vld [vmem:[%s2033_s1 + $0x1e8] sm:$0xff]   ;;  %v1506_v57 = vld [vmem:[%s2033_s1 + $0x170] sm:$0xff]  }
  0x18   : > { %v1500_v51 = vld [vmem:[%s2033_s1 + $0x120] sm:$0xff]   ;;  %v1504_v55 = vld [vmem:[%s2033_s1 + $0x128] sm:$0xff]   ;;  %v1507_v58 = vld [vmem:[%s2033_s1 + $0x1f0] sm:$0xff]  }
  0x19   : > { %1353 = vmatpush3.bf16.xpose.msra.mxu0 %v1459_v10  ;;  %v1501_v52 = vld [vmem:[%s2033_s1 + $0x1a0] sm:$0xff]   ;;  %v1505_v56 = vld [vmem:[%s2033_s1 + $0x1a8] sm:$0xff]   ;;  %v1508_v59 = vld [vmem:[%s2033_s1 + $0x130] sm:$0xff]  }
  0x1a   : > { %1371 = vmatpush3.bf16.xpose.msra.mxu1 %v1460_v11  ;;  %1354 = vmatprep.subr.bf16.mxu0 %v1461_v12  ;;  %v1509_v60 = vld [vmem:[%s2033_s1 + $0x1b0] sm:$0xff]   ;;  %v1510_v61 = vld [vmem:[%s2033_s1 + $0x178] sm:$0xff]  }
  0x1b   : > { %1372 = vmatprep.subr.bf16.mxu1 %v1462_v13  ;;  %v1511_v62 = vld [vmem:[%s2033_s1 + $0x1f8] sm:$0xff]  }
  0x1c   : > { %v1512_v63 = vld [vmem:[%s2033_s1 + $0x138] sm:$0xff]  }
  0x1d   : > { %v1513_v0 = vld [vmem:[%s2033_s1 + $0x1b8] sm:$0xff]  }
  0x21   : > { %1355 = vmatpush3.bf16.xpose.msra.mxu0 %v1463_v14 }
  0x22   : > { %1373 = vmatpush3.bf16.xpose.msra.mxu1 %v1464_v15  ;;  %1356 = vmatprep.subr.bf16.mxu0 %v1465_v16  ;;  %v934_v15 = vlaneseq }
  0x23   : > { %1374 = vmatprep.subr.bf16.mxu1 %v1466_v17 }
  0x24   : > { %v1856_v16 = vand.u32 127, %v934_v15 }
  0x26   : > { %v1859_v17 = vadd.s32 896, %v1856_v16 }
  0x28   : > { %vm1021_vm1 = vcmp.ge.s32.totalorder %v1859_v17, 1000 }
  0x29   : > { %1357 = vmatpush3.bf16.xpose.msra.mxu0 %v1467_v18 }
  0x2a   : > { %1375 = vmatpush3.bf16.xpose.msra.mxu1 %v1468_v19  ;;  %1358 = vmatprep.subr.bf16.mxu0 %v1469_v21 }
  0x2b   : > { %1376 = vmatprep.subr.bf16.mxu1 %v1470_v22 }
  0x31   : > { %1359 = vmatpush3.bf16.xpose.msra.mxu0 %v1471_v23 }
  0x32   : > { %1377 = vmatpush3.bf16.xpose.msra.mxu1 %v1472_v24  ;;  %1360 = vmatprep.subr.bf16.mxu0 %v1473_v25 }
  0x33   : > { %1378 = vmatprep.subr.bf16.mxu1 %v1474_v26 }
  0x39   : > { %1361 = vmatpush3.bf16.xpose.msra.mxu0 %v1475_v27 }
  0x3a   : > { %1379 = vmatpush3.bf16.xpose.msra.mxu1 %v1476_v28  ;;  %1362 = vmatprep.subr.bf16.mxu0 %v1477_v29 }
  0x3b   : > { %1380 = vmatprep.subr.bf16.mxu1 %v1478_v30 }
  0x41   : > { %1363 = vmatpush3.bf16.xpose.msra.mxu0 %v1479_v31 }
  0x42   : > { %1381 = vmatpush3.bf16.xpose.msra.mxu1 %v1480_v32  ;;  %1384 = vmatprep.subr.bf16.mxu0 %v1482_v33 }
  0x43   : > { %1402 = vmatprep.subr.bf16.mxu1 %v1483_v34 }
  0x48   : > { %1365 = vmatmul.mubr.bf16.vlgmr.msra.gmra.mrb[0].mxu0 %v1688_v20 }
  0x49   : > { %1383 = vmatmul.mubr.bf16.vlgmr.msra.gmra.mrb[0].mxu1 %v1688_v20  ;;  %1385 = vmatpush3.bf16.xpose.msra.mxu0 %v1484_v35 }
  0x4a   : > { %1403 = vmatpush3.bf16.xpose.msra.mxu1 %v1485_v36  ;;  %1386 = vmatprep.subr.bf16.mxu0 %v1486_v37 }
  0x4b   : > { %1404 = vmatprep.subr.bf16.mxu1 %v1487_v38  ;;  %1400 = vmatprep.mubr.bf16.mxu0 %v1688_v20  ;;  %v1898_v38 = vld [vmem:[%s222_s9] sm:$0xff] }
  0x4c   : > { %1418 = vmatprep.mubr.bf16.mxu1 %v1688_v20 }
  0x51   : > { %1387 = vmatpush3.bf16.xpose.msra.mxu0 %v1488_v39  ;;  %v1580_v39 = vmov 0.0  }
  0x52   : > { %1405 = vmatpush3.bf16.xpose.msra.mxu1 %v1489_v40  ;;  %1388 = vmatprep.subr.bf16.mxu0 %v1490_v41  ;;  %240 = vst.msk [vmem:[#allocation4] sm:$0xff] %vm235_vm0, %v1580_v39  ;;  %238 = vst.msk [vmem:[#allocation3] sm:$0xff] %vm235_vm0, %v1580_v39  ;;  %v1905_v40 = vld [vmem:[#allocation2] sm:$0xff] }
  0x53   : > { %1406 = vmatprep.subr.bf16.mxu1 %v1491_v42  ;;  %239 = vst.msk [vmem:[#allocation3 + $0x8] sm:$0xff] %vm235_vm0, %v1580_v39  ;;  %241 = vst.msk [vmem:[#allocation4 + $0x8] sm:$0xff] %vm235_vm0, %v1580_v39 }
  0x59   : > { %1389 = vmatpush3.bf16.xpose.msra.mxu0 %v1492_v43  ;;  %v1910_v43 = vld [vmem:[#allocation2 + $0x8] sm:$0xff] }
  0x5a   : > { %1407 = vmatpush3.bf16.xpose.msra.mxu1 %v1493_v44  ;;  %1390 = vmatprep.subr.bf16.mxu0 %v1494_v45 }
  0x5b   : > { %1408 = vmatprep.subr.bf16.mxu1 %v1495_v46 }
  0x61   : > { %1391 = vmatpush3.bf16.xpose.msra.mxu0 %v1496_v47 }
  0x62   : > { %1409 = vmatpush3.bf16.xpose.msra.mxu1 %v1497_v48  ;;  %1392 = vmatprep.subr.bf16.mxu0 %v1498_v49  ;;  %v1925_v48 = vld [vmem:[%s222_s9 + $0x8] sm:$0xff]  ;;  %v1928_v49 = vadd.s32 128, %v1856_v16 }
  0x63   : > { %1410 = vmatprep.subr.bf16.mxu1 %v1499_v50  ;;  %v1932_v50 = vadd.s32 256, %v1856_v16 }
  0x69   : > { %1393 = vmatpush3.bf16.xpose.msra.mxu0 %v1500_v51 }
  0x6a   : > { %1411 = vmatpush3.bf16.xpose.msra.mxu1 %v1501_v52  ;;  %1394 = vmatprep.subr.bf16.mxu0 %v1502_v53  ;;  %v1935_v52 = vadd.s32 384, %v1856_v16  ;;  %v1940_v53 = vadd.s32 512, %v1856_v16 }
  0x6b   : > { %1412 = vmatprep.subr.bf16.mxu1 %v1503_v54 }
  0x71   : > { %1395 = vmatpush3.bf16.xpose.msra.mxu0 %v1504_v55 }
  0x72   : > { %1413 = vmatpush3.bf16.xpose.msra.mxu1 %v1505_v56  ;;  %1396 = vmatprep.subr.bf16.mxu0 %v1506_v57  ;;  %v1946_v56 = vadd.s32 640, %v1856_v16 }
  0x73   : > { %1414 = vmatprep.subr.bf16.mxu1 %v1507_v58 }
  0x79   : > { %1397 = vmatpush3.bf16.xpose.msra.mxu0 %v1508_v59  ;;  %v1951_v59 = vadd.s32 768, %v1856_v16 }
  0x7a   : > { %1415 = vmatpush3.bf16.xpose.msra.mxu1 %v1509_v60  ;;  %1398 = vmatprep.subr.bf16.mxu0 %v1510_v61 }
  0x7b   : > { %1416 = vmatprep.subr.bf16.mxu1 %v1511_v62 }
  0x81   : > { %1399 = vmatpush3.bf16.xpose.msra.mxu0 %v1512_v63 }
  0x82   : > { %1417 = vmatpush3.bf16.xpose.msra.mxu1 %v1513_v0 }
  0x88   : > { %1401 = vmatmul.mubr.bf16.vlgmr.msra.gmra.mrb[4].mxu0 %v1688_v20 }
  0x89   : > { %1419 = vmatmul.mubr.bf16.vlgmr.msra.gmra.mrb[4].mxu1 %v1688_v20 }
 0x11b   : > { %v1832_v3 = vpop.f32.mrb[0].mxu0 }
 0x11c   : > { %v1834_v4 = vpop.f32.mrb[0].mxu1  ;;  %v1836_v5 = vpop.f32.mrb[1].mxu0 }
 0x11d   : > { %v1040_v6 = vmax.f32 %v1832_v3, %v1834_v4  ;;  %v1840_v7 = vpop.f32.mrb[1].mxu1  ;;  %v1842_v8 = vpop.f32.mrb[2].mxu0 }
 0x11e   : > { %v1041_v9 = vmax.f32 %v1836_v5, %v1840_v7  ;;  %v1846_v10 = vpop.f32.mrb[2].mxu1  ;;  %v1848_v11 = vpop.f32.mrb[3].mxu0 }
 0x11f   : > { %v1049_v12 = vmax.f32 %v1842_v8, %v1846_v10  ;;  %v1852_v13 = vpop.f32.mrb[3].mxu1 }
 0x120   : > { %v1050_v14 = vmax.f32 %v1848_v11, %v1852_v13 }
 0x15b   : > { %v1861_v18 = vpop.f32.mrb[4].mxu0 }
 0x15c   : > { %v1042_v19 = vmax.f32 %v1040_v6, %v1861_v18  ;;  %v1865_v20 = vpop.f32.mrb[4].mxu1  ;;  %v1867_v21 = vpop.f32.mrb[5].mxu0 }
 0x15d   : > { %v1043_v22 = vmax.f32 %v1041_v9, %v1867_v21  ;;  %v1870_v23 = vpop.f32.mrb[5].mxu1  ;;  %v1872_v24 = vpop.f32.mrb[6].mxu0 }
 0x15e   : > { %v1051_v25 = vmax.f32 %v1049_v12, %v1872_v24  ;;  %v1875_v26 = vpop.f32.mrb[6].mxu1  ;;  %v1877_v27 = vpop.f32.mrb[7].mxu0  ;;  %v1880_v28 = vsel %vm1021_vm1, -1e+30, %v1870_v23  ;;  %v1044_v29 = vmax.f32 %v1042_v19, %v1865_v20 }
 0x15f   : > { %v1052_v30 = vmax.f32 %v1050_v14, %v1877_v27  ;;  %v1884_v31 = vpop.f32.mrb[7].mxu1  ;;  %v1045_v32 = vmax.f32 %v1043_v22, %v1880_v28 }
 0x160   : > { %v1888_v33 = vsel %vm1021_vm1, -1e+30, %v1884_v31  ;;  %v1053_v34 = vmax.f32 %v1051_v25, %v1875_v26 }
 0x161   : > { %v1054_v35 = vmax.f32 %v1052_v30, %v1888_v33  ;;  %v1046_v36 = vmax.f32 %v1044_v29, %v1045_v32 }
 0x163   : > { %1047 = vmax.xlane.f32.xlu0 %v1046_v36  ;;  %v1055_v37 = vmax.f32 %v1053_v34, %v1054_v35 }
 0x167   : > { %1056 = vmax.xlane.f32.xlu0 %v1055_v37 }
 0x17d   : > { %952 = vperm.xlu0 %1448, %v1898_v38  }
 0x1f0   : > { %v1048_v41 = vpop.xlane.xlu0 %1047 }
 0x1f1   : > { %v1908_v42 = vmax.f32 %v1905_v40, %v1048_v41 }
 0x1f3   : > { %v1062_v44 = vsub.f32 %v1905_v40, %v1908_v42  ;;  %1150 = vst.msk [vmem:[#allocation2] sm:$0xff] %vm235_vm0, %v1908_v42  ;;  %1072 = vperm.xlu1 %1447, %v1908_v42   ;;  %v950_v40 = vld [vmem:[#allocation4 + $0x8] sm:$0xff] }
 0x1f4   : > { %v1057_v45 = vpop.xlane.xlu0 %1056 }
 0x1f5   : > { %v1918_v46 = vmax.f32 %v1910_v43, %v1057_v45 }
 0x1f7   : > { %v1063_v47 = vsub.f32 %v1910_v43, %v1918_v46  ;;  %1151 = vst.msk [vmem:[#allocation2 + $0x8] sm:$0xff] %vm235_vm0, %v1918_v46  ;;  %1077 = vperm.xlu1 %1447, %v1918_v46  }
 0x1fb   : > { %955 = vperm.xlu1 %1447, %v1925_v48  }
 0x1fc   : > { %v953_v51 = vpop.permute.xlu0 %952 }
 0x1fd   : > { %vm957_vm2 = vcmp.eq.s32.totalorder %v1856_v16, %v953_v51  ;;  %vm958_vm3 = vcmp.eq.s32.totalorder %v1928_v49, %v953_v51  ;;  %vm959_vm4 = vcmp.eq.s32.totalorder %v1932_v50, %v953_v51  ;;  %vm960_vm5 = vcmp.eq.s32.totalorder %v1935_v52, %v953_v51 }
 0x1fe   : > { %v973_v54 = vsel %vm957_vm2, %v1832_v3, 0.0  ;;  %v974_v55 = vsel %vm958_vm3, %v1836_v5, 0.0  ;;  %v975_v58 = vsel %vm959_vm4, %v1834_v4, 0.0  ;;  %vm961_vm6 = vcmp.eq.s32.totalorder %v1940_v53, %v953_v51 }
 0x1ff   : > { %v989_v57 = vadd.f32 %v974_v55, %v973_v54  ;;  %v976_v61 = vsel %vm960_vm5, %v1840_v7, 0.0  ;;  %vm962_vm7 = vcmp.eq.s32.totalorder %v1946_v56, %v953_v51  ;;  %v977_v63 = vsel %vm961_vm6, %v1861_v18, 0.0 }
 0x200   : > { %vm963_vm8 = vcmp.eq.s32.totalorder %v1951_v59, %v953_v51  ;;  %v978_v1 = vsel %vm962_vm7, %v1867_v21, 0.0  ;;  %vm964_vm9 = vcmp.eq.s32.totalorder %v1859_v17, %v953_v51  ;;  %vm1167_vm3 = vcmp.ne.s32.totalorder %v1898_v38, 4294967196 }
 0x201   : > { %v990_v60 = vadd.f32 %v989_v57, %v975_v58  ;;  %v979_v6 = vsel %vm963_vm8, %v1865_v20, 0.0  ;;  %v980_v12 = vsel %vm964_vm9, %v1870_v23, 0.0  ;;  %vm1168_vm4 = vcmp.ne.s32.totalorder %v1925_v48, 4294967196 }
 0x203   : > { %v991_v62 = vadd.f32 %v990_v60, %v976_v61 }
 0x205   : > { %v992_v0 = vadd.f32 %v991_v62, %v977_v63 }
 0x207   : > { %v993_v2 = vadd.f32 %v992_v0, %v978_v1 }
 0x209   : > { %v994_v9 = vadd.f32 %v993_v2, %v979_v6 }
 0x20b   : > { %v995_v14 = vadd.f32 %v994_v9, %v980_v12 }
 0x20d   : > { %996 = vadd.xlane.f32.xlu0 %v995_v14 }
 0x272   : > { %v1073_v15 = vpop.permute.xlu1 %1072 }
 0x273   : > { %v1080_v19 = vsub.f32 %v1832_v3, %v1073_v15  ;;  %v1081_v22 = vsub.f32 %v1836_v5, %v1073_v15  ;;  %v1082_v25 = vsub.f32 %v1834_v4, %v1073_v15  ;;  %v1083_v29 = vsub.f32 %v1840_v7, %v1073_v15 }
 0x274   : > { %v1084_v37 = vsub.f32 %v1861_v18, %v1073_v15  ;;  %v1085_v5 = vsub.f32 %v1867_v21, %v1073_v15  ;;  %v1086_v4 = vsub.f32 %v1865_v20, %v1073_v15  ;;  %v1087_v55 = vsub.f32 %v1880_v28, %v1073_v15 }
 0x275   : > { %v1096_v30 = vmul.f32 1.442695, %v1080_v19  ;;  %v1098_v32 = vmul.f32 1.442695, %v1081_v22  ;;  %v1100_v34 = vmul.f32 1.442695, %v1082_v25 }
 0x276   : > { %v1102_v35 = vmul.f32 1.442695, %v1083_v29  ;;  %v1078_v36 = vpop.permute.xlu1 %1077  ;;  %v1104_v18 = vmul.f32 1.442695, %v1084_v37  ;;  %v1106_v57 = vmul.f32 1.442695, %v1085_v5 }
 0x277   : > { %1514 = vpow2.f32 %v1096_v30  ;;  %v1088_v23 = vsub.f32 %v1842_v8, %v1078_v36  ;;  %v1089_v39 = vsub.f32 %v1848_v11, %v1078_v36  ;;  %v1090_v3 = vsub.f32 %v1846_v10, %v1078_v36 }
 0x278   : > { %1516 = vpow2.f32 %v1098_v32  ;;  %v1091_v51 = vsub.f32 %v1852_v13, %v1078_v36  ;;  %v1092_v58 = vsub.f32 %v1872_v24, %v1078_v36  ;;  %v1108_v20 = vmul.f32 1.442695, %v1086_v4 }
 0x279   : > { %1518 = vpow2.f32 %v1100_v34  ;;  %v1112_v7 = vmul.f32 1.442695, %v1088_v23  ;;  %v1114_v41 = vmul.f32 1.442695, %v1089_v39  ;;  %v1116_v45 = vmul.f32 1.442695, %v1090_v3 }
 0x27a   : > { %v1973_v54 = vpop.permute.xlu1 %955  ;;  %1520 = vpow2.f32 %v1102_v35  ;;  %v1118_v21 = vmul.f32 1.442695, %v1091_v51  ;;  %v1093_v60 = vsub.f32 %v1877_v27, %v1078_v36  ;;  %v1110_v61 = vmul.f32 1.442695, %v1087_v55 }
 0x27b   : > { %1522 = vpow2.f32 %v1112_v7  ;;  %vm965_vm10 = vcmp.eq.s32.totalorder %v1856_v16, %v1973_v54  ;;  %vm966_vm11 = vcmp.eq.s32.totalorder %v1928_v49, %v1973_v54  ;;  %v1094_v62 = vsub.f32 %v1875_v26, %v1078_v36 }
 0x27c   : > { %1524 = vpow2.f32 %v1114_v41  ;;  %v981_v28 = vsel %vm965_vm10, %v1842_v8, 0.0  ;;  %v1120_v63 = vmul.f32 1.442695, %v1092_v58  ;;  %vm967_vm12 = vcmp.eq.s32.totalorder %v1932_v50, %v1973_v54 }
 0x27d   : > { %1526 = vpow2.f32 %v1116_v45  ;;  %v982_v16 = vsel %vm966_vm11, %v1848_v11, 0.0  ;;  %v1095_v49 = vsub.f32 %v1888_v33, %v1078_v36  ;;  %v1122_v2 = vmul.f32 1.442695, %v1093_v60 }
 0x27e   : > { %1528 = vpow2.f32 %v1104_v18  ;;  %vm968_vm13 = vcmp.eq.s32.totalorder %v1935_v52, %v1973_v54  ;;  %v998_v6 = vadd.f32 %v982_v16, %v981_v28  ;;  %v983_v12 = vsel %vm967_vm12, %v1846_v10, 0.0  ;;  %v1060_v28 = vld [vmem:[#allocation3] sm:$0xff] }
 0x27f   : > { %1530 = vpow2.f32 %v1106_v57  ;;  %v1124_v50 = vmul.f32 1.442695, %v1094_v62  ;;  %vm969_vm14 = vcmp.eq.s32.totalorder %v1940_v53, %v1973_v54  ;;  %v984_v19 = vsel %vm968_vm13, %v1852_v13, 0.0 }
 0x280   : > { %1532 = vpow2.f32 %v1108_v20  ;;  %v999_v11 = vadd.f32 %v998_v6, %v983_v12  ;;  %v1126_v52 = vmul.f32 1.442695, %v1095_v49  ;;  %vm970_vm15 = vcmp.eq.s32.totalorder %v1946_v56, %v1973_v54  ;;  %v1155_v12 = vld [vmem:[#allocation2] sm:$0xff] }
 0x281   : > { %v1515_v0 = vpop.eup %1514  ;;  %1534 = vpow2.f32 %v1118_v21  ;;  %v985_v32 = vsel %vm969_vm14, %v1872_v24, 0.0  ;;  %vm971_vm1 = vcmp.eq.s32.totalorder %v1951_v59, %v1973_v54  ;;  %v986_v36 = vsel %vm970_vm15, %v1877_v27, 0.0 }
 0x282   : > { %v1517_v1 = vpop.eup %1516  ;;  %1536 = vpow2.f32 %v1110_v61  ;;  %v1000_v25 = vadd.f32 %v999_v11, %v984_v19  ;;  %vm972_vm2 = vcmp.eq.s32.totalorder %v1859_v17, %v1973_v54  ;;  %v987_v24 = vsel %vm971_vm1, %v1875_v26, 0.0  ;;  %v949_v26 = vld [vmem:[#allocation4] sm:$0xff] }
 0x283   : > { %v1519_v9 = vpop.eup %1518  ;;  %v1128_v8 = vadd.f32 %v1517_v1, %v1515_v0  ;;  %1538 = vpow2.f32 %v1120_v63  ;;  %v988_v41 = vsel %vm972_vm2, %v1884_v31, 0.0  ;;  %v1064_v31 = vmul.f32 1.442695, %v1062_v44  ;;  %v1061_v1 = vld [vmem:[#allocation3 + $0x8] sm:$0xff] }
 0x284   : > { %v1521_v14 = vpop.eup %1520  ;;  %1540 = vpow2.f32 %v1122_v2  ;;  %v1001_v53 = vadd.f32 %v1000_v25, %v985_v32  ;;  %v1066_v61 = vmul.f32 1.442695, %v1063_v47 }
 0x285   : > { %v1523_v33 = vpop.eup %1522  ;;  %v1129_v15 = vadd.f32 %v1519_v9, %v1128_v8  ;;  %1542 = vpow2.f32 %v1124_v50 }
 0x286   : > { %v1525_v22 = vpop.eup %1524  ;;  %1544 = vpow2.f32 %v1126_v52  ;;  %v1002_v56 = vadd.f32 %v1001_v53, %v986_v36 }
 0x287   : > { %v1527_v29 = vpop.eup %1526  ;;  %v1130_v10 = vadd.f32 %v1521_v14, %v1129_v15  ;;  %v1137_v30 = vadd.f32 %v1525_v22, %v1523_v33  ;;  %1546 = vpow2.f32 %v1064_v31  ;;  %v1156_v22 = vld [vmem:[#allocation2 + $0x8] sm:$0xff] }
 0x288   : > { %v1529_v34 = vpop.eup %1528  ;;  %v1003_v5 = vadd.f32 %v1002_v56, %v987_v24  ;;  %1548 = vpow2.f32 %v1066_v61 }
 0x289   : > { %v1131_v35 = vadd.f32 %v1529_v34, %v1130_v10  ;;  %v1138_v13 = vadd.f32 %v1527_v29, %v1137_v30  ;;  %v1531_v37 = vpop.eup %1530 }
 0x28a   : > { %v1533_v23 = vpop.eup %1532  ;;  %v1004_v51 = vadd.f32 %v1003_v5, %v988_v41 }
 0x28b   : > { %v1132_v39 = vadd.f32 %v1531_v37, %v1131_v35  ;;  %v1535_v3 = vpop.eup %1534 }
 0x28c   : > { %v1537_v4 = vpop.eup %1536  ;;  %v1139_v59 = vadd.f32 %v1535_v3, %v1138_v13 }
 0x28d   : > { %v1133_v7 = vadd.f32 %v1533_v23, %v1132_v39  ;;  %v1539_v45 = vpop.eup %1538 }
 0x28e   : > { %v1140_v18 = vadd.f32 %v1539_v45, %v1139_v59  ;;  %v1541_v55 = vpop.eup %1540 }
 0x28f   : > { %v1134_v27 = vadd.f32 %v1537_v4, %v1133_v7  ;;  %v1543_v17 = vpop.eup %1542 }
 0x290   : > { %v1141_v57 = vadd.f32 %v1541_v55, %v1140_v18  ;;  %v1545_v58 = vpop.eup %1544 }
 0x291   : > { %1135 = vadd.xlane.f32.xlu1 %v1134_v27  ;;  %v1547_v62 = vpop.eup %1546 }
 0x292   : > { %v1142_v54 = vadd.f32 %v1543_v17, %v1141_v57  ;;  %v1068_v63 = vmul.f32 %v1547_v62, %v1060_v28  ;;  %v1549_v49 = vpop.eup %1548 }
 0x293   : > { %v1069_v2 = vmul.f32 %v1549_v49, %v1061_v1 }
 0x294   : > { %v1143_v20 = vadd.f32 %v1545_v58, %v1142_v54 }
 0x296   : > { %1144 = vadd.xlane.f32.xlu1 %v1143_v20 }
 0x29a   : > { %1005 = vadd.xlane.f32.xlu1 %v1004_v51  ;;  %v997_v21 = vpop.xlane.xlu0 %996 }
 0x29b   : > { %v1007_v60 = vadd.f32 %v997_v21, %v949_v26 }
 0x29d   : > { %1010 = vst.msk [vmem:[#allocation4] sm:$0xff] %vm235_vm0, %v1007_v60 }
 0x2a4   : > { %v1169_v50 = vld [vmem:[#allocation4] sm:$0xff] }
 0x31e   : > { %v1136_v16 = vpop.xlane.xlu1 %1135 }
 0x31f   : > { %v1146_v0 = vadd.f32 %v1136_v16, %v1068_v63 }
 0x321   : > { %1148 = vst.msk [vmem:[#allocation3] sm:$0xff] %vm235_vm0, %v1146_v0 }
 0x323   : > { %v1145_v6 = vpop.xlane.xlu1 %1144 }
 0x324   : > { %v1147_v9 = vadd.f32 %v1145_v6, %v1069_v2 }
 0x326   : > { %1149 = vst.msk [vmem:[#allocation3 + $0x8] sm:$0xff] %vm235_vm0, %v1147_v9 }
 0x327   : > { %v1006_v43 = vpop.xlane.xlu1 %1005 }
 0x328   : > { %v1157_v42 = vld [vmem:[#allocation3] sm:$0xff]  ;;  %v1008_v44 = vadd.f32 %v1006_v43, %v950_v40 }
 0x329   : > { %1550 = vlog2.f32 %v1157_v42 }
 0x32a   : > { %1011 = vst.msk [vmem:[#allocation4 + $0x8] sm:$0xff] %vm235_vm0, %v1008_v44 }
 0x32d   : > { %v1158_v46 = vld [vmem:[#allocation3 + $0x8] sm:$0xff] }
 0x32e   : > { %1552 = vlog2.f32 %v1158_v46 }
 0x331   : > { %v1170_v25 = vld [vmem:[#allocation4 + $0x8] sm:$0xff] }
 0x333   : > { %v1551_v47 = vpop.eup %1550 }
 0x334   : > { %v1160_v8 = vmul.f32 0.6931472, %v1551_v47 }
 0x336   : > { %v1163_v14 = vadd.f32 %v1160_v8, %v1155_v12 }
 0x338   : > { %v1171_v11 = vsub.f32 %v1163_v14, %v1169_v50  ;;  %v1553_v33 = vpop.eup %1552 }
 0x339   : > { %v1162_v19 = vmul.f32 0.6931472, %v1553_v33 }
 0x33a   : > { %v1173_v15 = vsel %vm1167_vm3, %v1171_v11, 0.0 }
 0x33b   : > { %1175 = vst.msk [vmem:[%s228_s17] sm:$0xff] %vm235_vm0, %v1173_v15  ;;  %v1164_v52 = vadd.f32 %v1162_v19, %v1156_v22 }
 0x33d   : > { %v1172_v29 = vsub.f32 %v1164_v52, %v1170_v25 }
 0x33f   : > { %v1174_v10 = vsel %vm1168_vm4, %v1172_v29, 0.0 }
 0x340   : > { %1176 = vst.msk [vmem:[%s228_s17 + $0x8] sm:$0xff] %vm235_vm0, %v1174_v10 }
 0x341 PF: > { %s13_s14 = sadd.s32 1, %s1576_s14   ;;  %s2036_s12 = smov %s1572_s13 }
 0x342   : > { %p10_p5 = scmp.ge.s32.totalorder %s13_s14, 4   ;;  %s2037_s13 = smov %s2039_s15 }
 0x344   :  { %12 = sbr.rel (!%p10_p5) target bundleno = 2 (0x2), region = 76 }

</bundles_post_ra>
